<compile_context>
chip_gen: v7x
topology: tpu7x:2x2x1
jax: 0.10.0
libtpu: 0.0.40
codegen_flags: <defaults>
</compile_context>

<pallas_src>
import jax
import jax.numpy as jnp
from jax import lax
from jax.experimental import pallas as pl
from jax.experimental.pallas import tpu as pltpu

BN_EPS = 1e-5          # nn.BatchNorm2d default
LEAKY_SLOPE = 0.01     # nn.LeakyReLU default negative_slope


def _choose_tile_m(M):
    """Largest lane tile (multiple of 128, <= 2048) that divides M; else full M."""
    if M % 128 != 0:
        return M
    for cand in (2048, 1024, 512, 256, 128):
        if M % cand == 0:
            return cand
    return M  # unreachable (128 always divides M here)


# --------------------------- Pass 1: BN statistics ---------------------------
def _stats_kernel(x_ref, w_ref, sum_ref, ssq_ref):
    # x_ref:   (C_in,  tile_m)  f32   (batch dim squeezed)
    # w_ref:   (C_out, C_in)    f32
    # sum_ref: (C_out, 1)       f32   accumulator, resident across the M axis
    # ssq_ref: (C_out, 1)       f32   accumulator
    @pl.when(pl.program_id(1) == 0)
    def _():
        sum_ref[...] = jnp.zeros_like(sum_ref)
        ssq_ref[...] = jnp.zeros_like(ssq_ref)

    y = jnp.dot(w_ref[...], x_ref[...], preferred_element_type=jnp.float32)
    sum_ref[...] += jnp.sum(y, axis=1, keepdims=True)
    ssq_ref[...] += jnp.sum(y * y, axis=1, keepdims=True)


# ------------------- Pass 2: recompute + affine + LeakyReLU -------------------
def _apply_kernel(x_ref, w_ref, a_ref, b_ref, o_ref):
    # x_ref: (C_in, tile_m); w_ref: (C_out, C_in); a_ref/b_ref: (C_out, 1)
    y = jnp.dot(w_ref[...], x_ref[...], preferred_element_type=jnp.float32)
    z = a_ref[...] * y + b_ref[...]                       # folded BN affine (1 FMA)
    o_ref[...] = jnp.where(z >= 0, z, LEAKY_SLOPE * z).astype(o_ref.dtype)


def transition_forward(x_nchw, conv_w, bn_gamma, bn_beta):
    """x_nchw: (N, C_in, H, W); conv_w: (C_out, C_in, 1, 1); bn_gamma/bn_beta: (C_out,).
    Returns (N, C_out, H, W)."""
    N, C_in, H, W = x_nchw.shape
    C_out = conv_w.shape[0]
    M = H * W
    tile_m = _choose_tile_m(M)
    n_m = M // tile_m

    # Free re-layouts (trailing-dim merges only; no transposes, no extra HBM traffic).
    x3d = x_nchw.reshape(N, C_in, M).astype(jnp.float32)
    w2d = conv_w.reshape(C_out, C_in).astype(jnp.float32)

    # ---- Pass 1: per-sample, per-channel sum and sum-of-squares of y = W @ X ----
    sums, ssqs = pl.pallas_call(
        _stats_kernel,
        out_shape=(jax.ShapeDtypeStruct((N, C_out, 1), jnp.float32),
                   jax.ShapeDtypeStruct((N, C_out, 1), jnp.float32)),
        grid=(N, n_m),
        in_specs=[
            pl.BlockSpec((pl.Squeezed(), C_in, tile_m), lambda n, m: (n, 0, m)),
            pl.BlockSpec((C_out, C_in), lambda n, m: (0, 0)),
        ],
        out_specs=(
            pl.BlockSpec((pl.Squeezed(), C_out, 1), lambda n, m: (n, 0, 0)),
            pl.BlockSpec((pl.Squeezed(), C_out, 1), lambda n, m: (n, 0, 0)),
        ),
        compiler_params=pltpu.CompilerParams(
            dimension_semantics=("parallel", "arbitrary")),
    )(x3d, w2d)

    # Tiny (C_out,)-sized finalization of the batch statistics + folded affine.
    total = jnp.float32(N * M)
    s = jnp.sum(sums, axis=0)                     # (C_out, 1)
    ss = jnp.sum(ssqs, axis=0)                    # (C_out, 1)
    mean = s / total
    var = jnp.maximum(ss / total - mean * mean, 0.0)   # biased variance, clamped
    gamma = bn_gamma.reshape(C_out, 1).astype(jnp.float32)
    beta = bn_beta.reshape(C_out, 1).astype(jnp.float32)
    a = gamma * lax.rsqrt(var + BN_EPS)           # (C_out, 1)
    b = beta - a * mean                           # (C_out, 1)

    # ---- Pass 2: recompute y, apply z = a*y + b, LeakyReLU, store ----
    y3d = pl.pallas_call(
        _apply_kernel,
        out_shape=jax.ShapeDtypeStruct((N, C_out, M), jnp.float32),
        grid=(N, n_m),
        in_specs=[
            pl.BlockSpec((pl.Squeezed(), C_in, tile_m), lambda n, m: (n, 0, m)),
            pl.BlockSpec((C_out, C_in), lambda n, m: (0, 0)),
            pl.BlockSpec((C_out, 1), lambda n, m: (0, 0)),
            pl.BlockSpec((C_out, 1), lambda n, m: (0, 0)),
        ],
        out_specs=pl.BlockSpec((pl.Squeezed(), C_out, tile_m),
                               lambda n, m: (n, 0, m)),
        compiler_params=pltpu.CompilerParams(
            dimension_semantics=("parallel", "parallel")),
    )(x3d, w2d, a, b)

    # Free reshape back to NCHW.
    return y3d.reshape(N, C_out, H, W)


def reference_forward(x_nchw, conv_w, bn_gamma, bn_beta):
    """Pure-JAX reference: Conv2d(1x1, no bias) + BatchNorm2d(train) + LeakyReLU."""
    x = x_nchw.astype(jnp.float32)
    w = conv_w.reshape(conv_w.shape[0], conv_w.shape[1]).astype(jnp.float32)
    y = jnp.einsum('oc,nchw->nohw', w, x)
    mean = jnp.mean(y, axis=(0, 2, 3), keepdims=True)
    var = jnp.mean((y - mean) ** 2, axis=(0, 2, 3), keepdims=True)
    x_hat = (y - mean) * lax.rsqrt(var + BN_EPS)
    z = bn_gamma.reshape(1, -1, 1, 1) * x_hat + bn_beta.reshape(1, -1, 1, 1)
    return jnp.where(z >= 0, z, LEAKY_SLOPE * z)


if __name__ == "__main__":
    key = jax.random.PRNGKey(0)
    k_x, k_w = jax.random.split(key)

    N, C_in, C_out, H, W = 2, 4, 8, 16, 16

    x = jax.random.normal(k_x, (N, C_in, H, W), dtype=jnp.float32)

    # Deterministic parameter init (Conv2d kaiming-uniform-like range;
    # BatchNorm2d defaults: gamma=1, beta=0).
    fan_in = C_in * 1 * 1
    bound = (1.0 / fan_in) ** 0.5
    conv_w = jax.random.uniform(
        k_w, (C_out, C_in, 1, 1), minval=-bound, maxval=bound, dtype=jnp.float32)
    bn_gamma = jnp.ones((C_out,), dtype=jnp.float32)
    bn_beta = jnp.zeros((C_out,), dtype=jnp.float32)

    out = transition_forward(x, conv_w, bn_gamma, bn_beta)
    out = jax.block_until_ready(out)

    ref = reference_forward(x, conv_w, bn_gamma, bn_beta)
    assert out.shape == (N, C_out, H, W)
    assert jnp.allclose(out, ref, atol=1e-4, rtol=1e-4), "mismatch vs reference"

    print("KERNEL_OK")
</pallas_src>

<mosaic_0001>
module attributes {stable_mosaic.version = 11 : i64} {
  func.func @_stats_kernel(%arg0: i32, %arg1: i32, %arg2: memref<1x4x256xf32, #tpu.memory_space<vmem>>, %arg3: memref<8x4xf32, #tpu.memory_space<vmem>>, %arg4: memref<1x8x1xf32, #tpu.memory_space<vmem>>, %arg5: memref<1x8x1xf32, #tpu.memory_space<vmem>>) attributes {dimension_semantics = [#tpu.dimension_semantics<parallel>, #tpu.dimension_semantics<arbitrary>], iteration_bounds = array<i64: 2, 1>, scalar_prefetch = 0 : i64, scratch_operands = 0 : i64, tpu.core_type = #tpu.core_type<tc>, window_params = [{transform_indices = @transform_0, window_bounds = array<i64: 1, 4, 256>}, {pipeline_mode = #tpu.pipeline_mode<synchronous>, transform_indices = @transform_1, window_bounds = array<i64: 8, 4>}, {transform_indices = @transform_2, window_bounds = array<i64: 1, 8, 1>}, {transform_indices = @transform_3, window_bounds = array<i64: 1, 8, 1>}]} {
    %c0_i32 = arith.constant 0 : i32
    %0 = arith.cmpi eq, %arg1, %c0_i32 : i32
    %1 = arith.extui %0 : i1 to i32
    %c0_i32_0 = arith.constant 0 : i32
    %2 = arith.cmpi ne, %1, %c0_i32_0 : i32
    scf.if %2 {
      %cst_19 = arith.constant 0.000000e+00 : f32
      %24 = vector.broadcast %cst_19 : f32 to vector<8x1xf32>
      %c0_20 = arith.constant 0 : index
      %c0_21 = arith.constant 0 : index
      %c0_22 = arith.constant 0 : index
      %25 = vector.load %arg4[%c0_20, %c0_21, %c0_22] : memref<1x8x1xf32, #tpu.memory_space<vmem>>, vector<1x8x1xf32>
      %26 = vector.shape_cast %25 : vector<1x8x1xf32> to vector<8x1xf32>
      %27 = vector.shape_cast %24 : vector<8x1xf32> to vector<1x8x1xf32>
      tpu.vector_store %arg4[%c0_20, %c0_21, %c0_22], %27 {strides = array<i32>} : memref<1x8x1xf32, #tpu.memory_space<vmem>>, vector<1x8x1xf32>,
      %cst_23 = arith.constant 0.000000e+00 : f32
      %28 = vector.broadcast %cst_23 : f32 to vector<8x1xf32>
      %c0_24 = arith.constant 0 : index
      %c0_25 = arith.constant 0 : index
      %c0_26 = arith.constant 0 : index
      %29 = vector.load %arg5[%c0_24, %c0_25, %c0_26] : memref<1x8x1xf32, #tpu.memory_space<vmem>>, vector<1x8x1xf32>
      %30 = vector.shape_cast %29 : vector<1x8x1xf32> to vector<8x1xf32>
      %31 = vector.shape_cast %28 : vector<8x1xf32> to vector<1x8x1xf32>
      tpu.vector_store %arg5[%c0_24, %c0_25, %c0_26], %31 {strides = array<i32>} : memref<1x8x1xf32, #tpu.memory_space<vmem>>, vector<1x8x1xf32>,
    } else {
    }
    %c0 = arith.constant 0 : index
    %c0_1 = arith.constant 0 : index
    %3 = vector.load %arg3[%c0, %c0_1] : memref<8x4xf32, #tpu.memory_space<vmem>>, vector<8x4xf32>
    %c0_2 = arith.constant 0 : index
    %c0_3 = arith.constant 0 : index
    %c0_4 = arith.constant 0 : index
    %4 = vector.load %arg2[%c0_2, %c0_3, %c0_4] : memref<1x4x256xf32, #tpu.memory_space<vmem>>, vector<1x4x256xf32>
    %5 = vector.shape_cast %4 : vector<1x4x256xf32> to vector<4x256xf32>
    %cst = arith.constant dense<0.000000e+00> : vector<8x256xf32>
    %6 = tpu.matmul %3, %5, %cst {dimension_numbers = #tpu.dot_dimension_numbers<[1], [0], [0], [1], [0, 0, 1, 1], [], []>} : vector<8x4xf32>, vector<4x256xf32>, vector<8x256xf32> -> vector<8x256xf32>
    %c0_5 = arith.constant 0 : index
    %c0_6 = arith.constant 0 : index
    %c0_7 = arith.constant 0 : index
    %7 = vector.load %arg4[%c0_5, %c0_6, %c0_7] : memref<1x8x1xf32, #tpu.memory_space<vmem>>, vector<1x8x1xf32>
    %8 = vector.shape_cast %7 : vector<1x8x1xf32> to vector<8x1xf32>
    %cst_8 = arith.constant dense<0.000000e+00> : vector<8xf32>
    %9 = vector.multi_reduction <add>, %6, %cst_8 [1] : vector<8x256xf32> to vector<8xf32>
    %10 = vector.shape_cast %9 : vector<8xf32> to vector<8x1xf32>
    %11 = arith.addf %8, %10 : vector<8x1xf32>
    %c0_9 = arith.constant 0 : index
    %c0_10 = arith.constant 0 : index
    %c0_11 = arith.constant 0 : index
    %12 = vector.load %arg4[%c0_9, %c0_10, %c0_11] : memref<1x8x1xf32, #tpu.memory_space<vmem>>, vector<1x8x1xf32>
    %13 = vector.shape_cast %12 : vector<1x8x1xf32> to vector<8x1xf32>
    %14 = vector.shape_cast %11 : vector<8x1xf32> to vector<1x8x1xf32>
    tpu.vector_store %arg4[%c0_9, %c0_10, %c0_11], %14 {strides = array<i32>} : memref<1x8x1xf32, #tpu.memory_space<vmem>>, vector<1x8x1xf32>,
    %c0_12 = arith.constant 0 : index
    %c0_13 = arith.constant 0 : index
    %c0_14 = arith.constant 0 : index
    %15 = vector.load %arg5[%c0_12, %c0_13, %c0_14] : memref<1x8x1xf32, #tpu.memory_space<vmem>>, vector<1x8x1xf32>
    %16 = vector.shape_cast %15 : vector<1x8x1xf32> to vector<8x1xf32>
    %17 = arith.mulf %6, %6 : vector<8x256xf32>
    %cst_15 = arith.constant dense<0.000000e+00> : vector<8xf32>
    %18 = vector.multi_reduction <add>, %17, %cst_15 [1] : vector<8x256xf32> to vector<8xf32>
    %19 = vector.shape_cast %18 : vector<8xf32> to vector<8x1xf32>
    %20 = arith.addf %16, %19 : vector<8x1xf32>
    %c0_16 = arith.constant 0 : index
    %c0_17 = arith.constant 0 : index
    %c0_18 = arith.constant 0 : index
    %21 = vector.load %arg5[%c0_16, %c0_17, %c0_18] : memref<1x8x1xf32, #tpu.memory_space<vmem>>, vector<1x8x1xf32>
    %22 = vector.shape_cast %21 : vector<1x8x1xf32> to vector<8x1xf32>
    %23 = vector.shape_cast %20 : vector<8x1xf32> to vector<1x8x1xf32>
    tpu.vector_store %arg5[%c0_16, %c0_17, %c0_18], %23 {strides = array<i32>} : memref<1x8x1xf32, #tpu.memory_space<vmem>>, vector<1x8x1xf32>,
    return
  }
  func.func @transform_0(%arg0: i32, %arg1: i32) -> (i32, i32, i32) {
    %c0_i32 = arith.constant 0 : i32
    %c0_i32_0 = arith.constant 0 : i32
    return %arg0, %c0_i32, %arg1 : i32, i32, i32
  }
  func.func @transform_1(%arg0: i32, %arg1: i32) -> (i32, i32) {
    %c0_i32 = arith.constant 0 : i32
    %c0_i32_0 = arith.constant 0 : i32
    %c0_i32_1 = arith.constant 0 : i32
    return %c0_i32, %c0_i32_0 : i32, i32
  }
  func.func @transform_2(%arg0: i32, %arg1: i32) -> (i32, i32, i32) {
    %c0_i32 = arith.constant 0 : i32
    %c0_i32_0 = arith.constant 0 : i32
    %c0_i32_1 = arith.constant 0 : i32
    return %arg0, %c0_i32, %c0_i32_0 : i32, i32, i32
  }
  func.func @transform_3(%arg0: i32, %arg1: i32) -> (i32, i32, i32) {
    %c0_i32 = arith.constant 0 : i32
    %c0_i32_0 = arith.constant 0 : i32
    %c0_i32_1 = arith.constant 0 : i32
    return %arg0, %c0_i32, %c0_i32_0 : i32, i32, i32
  }
}

</mosaic_0001>

<bundles_post_ra>
// kernel: tpu_custom_call.1
= control target key start
LH: loop header
LB: loop body
LE: loop exit
PB: predicated region body
PF: predicated region fallthrough
CT: control target
= control target key end

     0   :  { %9 = vsyncpa [#allocation3], 0  ;;  %s741_s0 = inlined_call_operand.hbm [shape: f32[2,4,256], index: 0, kind: input, shape index: {}]   ;;  %s742_s1 = inlined_call_operand.vmem [shape: f32[8,4], index: 1, kind: input, shape index: {}]   ;;  %s743_s2 = inlined_call_operand.vmem [shape: f32[2,8,1], index: 2, kind: output, shape index: {0}]   ;;  %s744_s3 = inlined_call_operand.vmem [shape: f32[2,8,1], index: 3, kind: output, shape index: {1}]  }
   0x1   :  { %11 = vsyncpa [#allocation3 + $0x1], 0  ;;  %s606_s12 = smov 0   ;;  %s608_s13 = smov 0  }
   0x2   :  { %s610_s14 = smov 0   ;;  %s612_s15 = smov 0  }
   0x3   :  { %s614_s16 = smov 0   ;;  %s616_s17 = smov 0  }
   0x4 LB: > { %s428_s18 = sadd.s32 4294967295, %s582_s17   ;;  %s29_s19 = sadd.s32 1, %s578_s16  ;;  %s582_s17 = sphi %s616_s17, %s17_s17   ;;  %s578_s16 = sphi %s614_s16, %s754_s16   ;;  %s574_s15 = sphi %s612_s15, %s753_s15   ;;  %s570_s14 = sphi %s610_s14, %s752_s14   ;;  %s566_s13 = sphi %s608_s13, %s751_s13   ;;  %s562_s12 = sphi %s606_s12, %s750_s12  }
   0x5   : > { %p31_p0 = scmp.ge.s32.totalorder %s29_s19, 2  ;;  %s38_s20 = sadd.s32 1, %s570_s14 }
   0x6   : > { %p45_p1 = scmp.ne.s32.totalorder %s570_s14, %s566_s13  ;;  %p46_p2 = scmp.eq.s32.totalorder %s582_s17, 0 }
   0x7   : > { %s756_s19 = smov (%p31_p0, %s29_s19), 0  ;;  %p51_p4 = scmp.ne.s32.totalorder %s566_s13, %s562_s12 }
   0x8   : > { %p642_p3 = por %p46_p2, %p45_p1  ;;  %s33_s22 = ssub.s32 %s578_s16, %s756_s19 }
   0x9   : > { %p52_p5 = scmp.eq.s32.totalorder %s428_s18, 0  ;;  %p36_p6 = scmp.eq.s32.totalorder %s33_s22, 0 }
   0xa   : > { %p451_p8 = scmp.lt.s32.totalorder %s582_s17, 2  ;;  %s151_s25 = sand.u32 1, %s570_s14  }
   0xb   : > { %p649_p7 = por %p52_p5, %p51_p4  ;;  %s444_s26 = sshll.u32 %s578_s16, 7 }
   0xc   : > { %s655_s24 = scalar_select %p36_p6, %s570_s14, %s38_s20  }
   0xd   : > { %s432_s27 = sshll.u32 %s151_s25, 3  ;;  %s662_s30 = scalar_lea.hbm %s741_s0, %s444_s26 }
   0xe   : > { %s155_s4 = scalar_lea.vmem [#allocation2], %s432_s27  ;;  %p666_p9 = pnand %p451_p8, %p642_p3 }
   0xf   : > { %s165_s5 = sshll.u32 %s155_s4, 4  ;;  %s152_s7 = scalar_lea.sflag [#allocation3], %s151_s25  ;;  %s670_s5 = int_to_ptr.vmem [resolvable:$true] %s165_s5 }
  0x10   : > { %s502_s8 = scalar_lea.hbm %s662_s30, 128  ;;  %p504_p13 = pneg %p666_p9 }
  0x11   : > { %p503_p12 = scmp.ne.s32.totalorder %s662_s30, %s502_s8  ;;  %s507_s11 = scalar_lea.hbm %s741_s0, 256 }
  0x12   : > { %p508_p2 = scmp.lt.u32.totalorder %s662_s30, %s741_s0  ;;  %p509_p3 = scmp.lt.u32.totalorder %s507_s11, %s502_s8 }
  0x13   : > { %p505_p0 = pnand %p504_p13, %p503_p12  ;;  %p511_p5 = scmp.lt.u32.totalorder %s502_s8, %s662_s30 }
  0x14   : > { %p510_p4 = por %p509_p3, %p508_p2 }
  0x15   : > { %p506_p1 = pneg %p505_p0 }
  0x16   : > { %p512_p6 = por %p511_p5, %p510_p4 }
  0x18   : > { %p513_p8 = pnand %p512_p6, %p506_p1 }
  0x1a   : > { %516 = shalt.err (!%p513_p8)
}
  0x1b   : > { %s517_s20 = scalar_lea.vmem %s670_s5, 128  ;;  %s584_s21 = smov [#allocation2]  }
  0x1c   : > { %p518_p12 = scmp.ne.s32.totalorder %s670_s5, %s517_s20  ;;  %s522_s22 = sshll.u32 %s584_s21, 4  ;;  %s523_s22 = int_to_ptr.vmem [resolvable:$false] %s522_s22 }
  0x1d   : > { %s524_s25 = scalar_lea.vmem %s523_s22, 256  ;;  %p525_p11 = scmp.lt.s32.totalorder %s670_s5, %s523_s22 }
  0x1e   : > { %p520_p0 = pnand %p518_p12, %p504_p13  ;;  %p526_p2 = scmp.lt.s32.totalorder %s524_s25, %s517_s20 }
  0x20   : > { %p521_p10 = pneg %p520_p0  ;;  %p527_p3 = por %p526_p2, %p525_p11 }
  0x22   : > { %p528_p4 = pnand %p527_p3, %p521_p10 }
  0x24   : > { %531 = shalt.err (!%p528_p4)
}
  0x25   : > { %450 = dma.hbm_to_vmem [thread:$0]  (!%p666_p9), %s662_s30, 128, %s670_s5, %s152_s7  }
  0x26   : > { %p748_p1 = scmp.lt.s32.totalorder %s582_s17, 3  ;;  %p749_p5 = scmp.ge.s32.totalorder %s582_s17, 1 }
  0x28   : > { %p171_p13 = pnand %p749_p5, %p748_p1 }
  0x29   : > { %s176_s26 = sand.u32 (!%p171_p13), 1, %s566_s13  }
  0x2a   : > { %174 = sbr.rel (%p171_p13) target bundleno = 419 (0x1a3), region = 28  ;;  %s436_s27 = sshll.u32 (!%p171_p13), %s176_s26, 3 }
  0x2b   : > { %s177_s28 = scalar_lea.sflag (!%p171_p13), [#allocation3], %s176_s26  ;;  %s180_s29 = scalar_lea.vmem (!%p171_p13), [#allocation2], %s436_s27 }
  0x31   : > { %557 = dma.done.wait (%p649_p7), %s177_s28, 128  }
  0x32   : > { %559 = vsyncadd (%p649_p7), %s177_s28, 4294967168  ;;  %v585_v0 = vmov 0.0   ;;  %v223_v1 = vld [vmem:[%s180_s29] sm:$0xff]  ;;  %vm230_vm0 = vcmask 1043456   ;;  %vm226_vm1 = vcmask 31744   ;;  %p207_p9 = scmp.lt.s32.totalorder %s574_s15, 1 }
  0x33   : > { %299 = vmatprep.mubr.f32.mxu0 %v585_v0  ;;  %v225_v2 = vcombine.high %v223_v1, %v223_v1  ;;  %v222_v3 = vld [vmem:[%s742_s1] sm:$0xff]  ;;  %vm219_vm2 = vcmask 7168  }
  0x34   : > { %s758_s15 = smov (!%p207_p9, %s574_s15), 1 }
  0x35   : > { %439 = vmatprep.subr.msk.mxu0 %vm230_vm0, %v225_v2  ;;  %s437_s23 = sshll.u32 %s758_s15, 3 }
  0x36   : > { %440 = vmatpush1.msk.msra.mxu0 %vm230_vm0, %v223_v1  ;;  %s210_s7 = scalar_lea.vmem %s743_s2, %s437_s23  ;;  %s214_s10 = scalar_lea.vmem %s744_s3, %s437_s23 }
  0x37   : > { %441 = vmatmul.mubr.msk.f32.vlgmr.msra.gmra.mrb[0].mxu0 %vm226_vm1, %v222_v3  ;;  %220 = vst.msk [vmem:[%s210_s7] sm:$0xff] %vm219_vm2, %v585_v0  ;;  %221 = vst.msk [vmem:[%s214_s10] sm:$0xff] %vm219_vm2, %v585_v0 }
  0x3e   : > { %v306_v10 = vld [vmem:[%s210_s7] sm:$0xff] }
  0x3f   : > { %v313_v13 = vld [vmem:[%s214_s10] sm:$0xff] }
 0x10a   : > { %v301_v4 = vpop.f32.mrb[0].mxu0 }
 0x10b   : > { %v314_v5 = vmul.f32 %v301_v4, %v301_v4  ;;  %v303_v6 = vpop.f32.mrb[1].mxu0 }
 0x10c   : > { %v315_v7 = vmul.f32 %v303_v6, %v303_v6  ;;  %v307_v8 = vadd.f32 %v303_v6, %v301_v4 }
 0x10e   : > { %308 = vadd.xlane.f32.xlu0 %v307_v8  ;;  %v316_v9 = vadd.f32 %v315_v7, %v314_v5 }
 0x112   : > { %317 = vadd.xlane.f32.xlu0 %v316_v9 }
 0x19b   : > { %v309_v11 = vpop.xlane.xlu0 %308 }
 0x19c   : > { %v310_v12 = vadd.f32 %v309_v11, %v306_v10 }
 0x19e   : > { %312 = vst.msk [vmem:[%s210_s7] sm:$0xff] %vm219_vm2, %v310_v12 }
 0x19f   : > { %v318_v14 = vpop.xlane.xlu0 %317 }
 0x1a0   : > { %v319_v15 = vadd.f32 %v318_v14, %v313_v13 }
 0x1a2   : > { %320 = vst.msk [vmem:[%s214_s10] sm:$0xff] %vm219_vm2, %v319_v15 }
 0x1a3 PF: > { %s17_s17 = sadd.s32 1, %s582_s17   ;;  %s750_s12 = smov %s566_s13 }
 0x1a4   : > { %p14_p7 = scmp.ge.s32.totalorder %s17_s17, 4   ;;  %s751_s13 = smov %s570_s14 }
 0x1a5   : > { %s752_s14 = smov %s655_s24  ;;  %s753_s15 = smov %s578_s16 }
 0x1a6   : > { %s754_s16 = smov %s756_s19  ;;  %16 = sbr.rel (!%p14_p7) target bundleno = 4 (0x4), region = 84 }
 0x1ad   :  { %354 = vsyncpa [#allocation3], 1 }
 0x1ae   :  { %356 = vsyncpa [#allocation3 + $0x1], 1 }

</bundles_post_ra>
